<compile_context>
chip_gen: v5e
topology: v5e:2x2
jax: 0.10.0
libtpu: 0.0.40
codegen_flags: <defaults>
</compile_context>

<pallas_src>
import jax
import jax.numpy as jnp
from jax.experimental import pallas as pl
from jax.experimental.pallas import tpu as pltpu

EPS = 1e-5  # nn.InstanceNorm2d default eps (affine=False, biased variance)


# ------------------------- fused per-level Pallas kernel -------------------------

def _make_layer_kernel(H, W, Cin, C, has_res):
    """Fused: y = conv1x1(x) + b (+ res);  out = relu(instnorm(conv3x3_valid(y) + b))."""
    Ho, Wo = H - 2, W - 2
    P = Ho * Wo

    def kernel(*refs):
        if has_res:
            (x_ref, wb_ref, bb_ref, wm_ref, bm_ref, res_ref,
             o_ref, y_scr, conv_scr) = refs
        else:
            (x_ref, wb_ref, bb_ref, wm_ref, bm_ref,
             o_ref, y_scr, conv_scr) = refs

        # ---- stage 1: 1x1 bottleneck conv + bias (+ top-down residual) ----
        y = jnp.dot(x_ref[0], wb_ref[...], preferred_element_type=jnp.float32)
        y = y + bb_ref[...]
        if has_res:
            y = y + res_ref[0]
        y_scr[...] = y                               # (H*W, C) stays resident in VMEM

        # ---- stage 2: 3x3 VALID conv as 9 accumulated taps, row by row ----
        w_taps = [wm_ref[k] for k in range(9)]       # 9 x (C, C), loop-invariant
        bm = bm_ref[...]                             # (1, C)

        def conv_row(h, carry):
            s, ss = carry
            acc = jnp.zeros((Wo, C), jnp.float32)
            for dh in range(3):
                base = (h + dh) * W
                if W % 8 == 0:
                    base = pl.multiple_of(base, 8)   # sublane-aligned dynamic slice
                rows = y_scr[pl.ds(base, W), :]      # input row h+dh: (W, C)
                for dw in range(3):
                    acc += jnp.dot(rows[dw:dw + Wo, :], w_taps[dh * 3 + dw],
                                   preferred_element_type=jnp.float32)
            acc = acc + bm
            conv_scr[h] = acc                        # pre-norm conv output row h
            # per-channel sum / sum-of-squares for InstanceNorm
            s = s + jnp.sum(acc, axis=0, keepdims=True)
            ss = ss + jnp.sum(acc * acc, axis=0, keepdims=True)
            return s, ss

        zero = jnp.zeros((1, C), jnp.float32)
        s, ss = jax.lax.fori_loop(0, Ho, conv_row, (zero, zero))

        # ---- stage 3: InstanceNorm2d (biased variance) + ReLU, one VMEM pass ----
        mean = s / P                                 # (1, C)
        var = ss / P - mean * mean
        inv = jax.lax.rsqrt(var + EPS)
        o_ref[0] = jnp.maximum((conv_scr[...] - mean) * inv, 0.0)

    return kernel


# ------------------------- wrappers -------------------------

def fused_layer(x_nhwc, res_nhwc, wb, bb, wm, bm):
    """One pyramid level: conv_bottleneck (+ top-down add) -> MBlock.

    x_nhwc: (B,H,W,Cin); res_nhwc: (B,H,W,C) or None; wb: (Cin,C); bb: (C,);
    wm: (3,3,C,C) HWIO; bm: (C,). Returns (B, H-2, W-2, C) NHWC float32.
    """
    B, H, W, Cin = x_nhwc.shape
    C = wb.shape[1]
    Ho, Wo = H - 2, W - 2
    has_res = res_nhwc is not None

    x_flat = x_nhwc.reshape(B, H * W, Cin)           # free reshape (row-major)
    wm9 = wm.reshape(9, C, C)                        # tap order (dh, dw) matches kernel
    bb2 = bb.reshape(1, C)
    bm2 = bm.reshape(1, C)

    in_specs = [
        pl.BlockSpec((1, H * W, Cin), lambda n: (n, 0, 0)),
        pl.BlockSpec((Cin, C), lambda n: (0, 0)),
        pl.BlockSpec((1, C), lambda n: (0, 0)),
        pl.BlockSpec((9, C, C), lambda n: (0, 0, 0)),
        pl.BlockSpec((1, C), lambda n: (0, 0)),
    ]
    args = [x_flat, wb, bb2, wm9, bm2]
    if has_res:
        in_specs.append(pl.BlockSpec((1, H * W, C), lambda n: (n, 0, 0)))
        args.append(res_nhwc.reshape(B, H * W, C))

    out = pl.pallas_call(
        _make_layer_kernel(H, W, Cin, C, has_res),
        grid=(B,),
        in_specs=in_specs,
        out_specs=pl.BlockSpec((1, Ho, Wo, C), lambda n: (n, 0, 0, 0)),
        out_shape=jax.ShapeDtypeStruct((B, Ho, Wo, C), jnp.float32),
        scratch_shapes=[
            pltpu.VMEM((H * W, C), jnp.float32),     # bottleneck output y
            pltpu.VMEM((Ho, Wo, C), jnp.float32),    # pre-norm 3x3 conv output
        ],
        compiler_params=pltpu.CompilerParams(
            dimension_semantics=("parallel",),            # v7x: 2 TCs split the batch
            vmem_limit_bytes=32 * 1024 * 1024,            # explicit (v5e default is 16 MiB)
        ),
    )(*args)
    return out


def upsample_nearest(x, Ht, Wt):
    """PyTorch UpsamplingNearest2d(size=(Ht,Wt)): src = floor(dst * in/out). x: NHWC."""
    B, H, W, C = x.shape
    hi = (jnp.arange(Ht) * H) // Ht
    wi = (jnp.arange(Wt) * W) // Wt
    return x[:, hi][:, :, wi]


def top_down_pathway(bottom_up_nchw, params):
    """Mirrors TopDownPathway.forward. bottom_up_nchw: list of NCHW arrays."""
    n = len(bottom_up_nchw)
    pyramid = []
    x = None
    for i in range(n):
        wb, bb, wm, bm = params[i]
        feat = jnp.transpose(bottom_up_nchw[i], (0, 2, 3, 1))   # NCHW -> NHWC
        res = x if i >= 1 else None                             # no zeros residual on layer 0
        y = fused_layer(feat, res, wb, bb, wm, bm)              # one pallas_call per level
        pyramid.append(jnp.transpose(y, (0, 3, 1, 2)))          # back to NCHW
        if i + 1 < n:
            Ht, Wt = bottom_up_nchw[i + 1].shape[-2:]
            x = upsample_nearest(y, Ht, Wt)
    return pyramid


# ------------------------- pure-JAX reference -------------------------

def _instance_norm(x):  # NHWC, per (n, c) over H, W
    mean = x.mean(axis=(1, 2), keepdims=True)
    var = ((x - mean) ** 2).mean(axis=(1, 2), keepdims=True)
    return (x - mean) * jax.lax.rsqrt(var + EPS)


def reference(bottom_up_nchw, params):
    n = len(bottom_up_nchw)
    pyramid = []
    x = None
    for i in range(n):
        wb, bb, wm, bm = params[i]
        feat = jnp.transpose(bottom_up_nchw[i], (0, 2, 3, 1))
        y = jnp.einsum('bhwi,io->bhwo', feat, wb) + bb
        if i >= 1:
            y = y + x
        z = jax.lax.conv_general_dilated(
            y, wm, window_strides=(1, 1), padding='VALID',
            dimension_numbers=('NHWC', 'HWIO', 'NHWC')) + bm
        z = jnp.maximum(_instance_norm(z), 0.0)
        pyramid.append(jnp.transpose(z, (0, 3, 1, 2)))
        if i + 1 < n:
            Ht, Wt = bottom_up_nchw[i + 1].shape[-2:]
            x = upsample_nearest(z, Ht, Wt)
    return pyramid


# ------------------------- main -------------------------

if __name__ == "__main__":
    key = jax.random.PRNGKey(0)
    # Small but structurally faithful instantiation of
    # TopDownPathway(top_features, in_features, n_layers).
    top_features, in_features, n_layers = 64, 32, 4
    B = 2
    spatial = [8, 16, 24, 32]  # bottom-up pyramid (coarse -> fine)

    # Deterministic parameter init (synthetic; no checkpoint load).
    params = []
    tf = top_features
    for i in range(n_layers):
        key, k1, k2, k3, k4 = jax.random.split(key, 5)
        wb = jax.random.normal(k1, (tf, in_features), jnp.float32) * 0.1          # 1x1 conv as (Cin,Cout)
        bb = jax.random.normal(k2, (in_features,), jnp.float32) * 0.1
        wm = jax.random.normal(k3, (3, 3, in_features, in_features), jnp.float32) * 0.05  # HWIO
        bm = jax.random.normal(k4, (in_features,), jnp.float32) * 0.05
        params.append((wb, bb, wm, bm))
        tf //= 2

    # Bottom-up features (NCHW, matching the PyTorch module's input convention).
    bottom_up = []
    tf = top_features
    for i in range(n_layers):
        key, k = jax.random.split(key)
        bottom_up.append(
            jax.random.normal(k, (B, tf, spatial[i], spatial[i]), jnp.float32))
        tf //= 2

    outs = jax.block_until_ready(top_down_pathway(bottom_up, params))
    refs = reference(bottom_up, params)
    for o, r in zip(outs, refs):
        assert o.shape == r.shape, (o.shape, r.shape)
        assert jnp.allclose(o, r, atol=5e-2, rtol=5e-2), float(jnp.max(jnp.abs(o - r)))
    print("KERNEL_OK")
</pallas_src>

<mosaic_0001>
module attributes {stable_mosaic.version = 11 : i64} {
  func.func @kernel(%arg0: i32, %arg1: memref<1x64x64xf32, #tpu.memory_space<vmem>>, %arg2: memref<64x32xf32, #tpu.memory_space<vmem>>, %arg3: memref<1x32xf32, #tpu.memory_space<vmem>>, %arg4: memref<9x32x32xf32, #tpu.memory_space<vmem>>, %arg5: memref<1x32xf32, #tpu.memory_space<vmem>>, %arg6: memref<1x6x6x32xf32, #tpu.memory_space<vmem>>, %arg7: memref<64x32xf32, #tpu.memory_space<vmem>>, %arg8: memref<6x6x32xf32, #tpu.memory_space<vmem>>) attributes {dimension_semantics = [#tpu.dimension_semantics<parallel>], iteration_bounds = array<i64: 2>, scalar_prefetch = 0 : i64, scratch_operands = 2 : i64, tpu.core_type = #tpu.core_type<tc>, window_params = [{transform_indices = @transform_0, window_bounds = array<i64: 1, 64, 64>}, {pipeline_mode = #tpu.pipeline_mode<synchronous>, transform_indices = @transform_1, window_bounds = array<i64: 64, 32>}, {pipeline_mode = #tpu.pipeline_mode<synchronous>, transform_indices = @transform_2, window_bounds = array<i64: 1, 32>}, {pipeline_mode = #tpu.pipeline_mode<synchronous>, transform_indices = @transform_3, window_bounds = array<i64: 9, 32, 32>}, {pipeline_mode = #tpu.pipeline_mode<synchronous>, transform_indices = @transform_4, window_bounds = array<i64: 1, 32>}, {transform_indices = @transform_5, window_bounds = array<i64: 1, 6, 6, 32>}]} {
    %c0 = arith.constant 0 : index
    %c0_0 = arith.constant 0 : index
    %c0_1 = arith.constant 0 : index
    %0 = vector.load %arg1[%c0, %c0_0, %c0_1] : memref<1x64x64xf32, #tpu.memory_space<vmem>>, vector<1x64x64xf32>
    %1 = vector.shape_cast %0 : vector<1x64x64xf32> to vector<64x64xf32>
    %c0_2 = arith.constant 0 : index
    %c0_3 = arith.constant 0 : index
    %2 = vector.load %arg2[%c0_2, %c0_3] : memref<64x32xf32, #tpu.memory_space<vmem>>, vector<64x32xf32>
    %cst = arith.constant dense<0.000000e+00> : vector<64x32xf32>
    %3 = tpu.matmul %1, %2, %cst {dimension_numbers = #tpu.dot_dimension_numbers<[1], [0], [0], [1], [0, 0, 1, 1], [], []>} : vector<64x64xf32>, vector<64x32xf32>, vector<64x32xf32> -> vector<64x32xf32>
    %c0_4 = arith.constant 0 : index
    %c0_5 = arith.constant 0 : index
    %4 = vector.load %arg3[%c0_4, %c0_5] : memref<1x32xf32, #tpu.memory_space<vmem>>, vector<1x32xf32>
    %5 = vector.broadcast %4 : vector<1x32xf32> to vector<64x32xf32>
    %6 = arith.addf %3, %5 : vector<64x32xf32>
    %c0_6 = arith.constant 0 : index
    %c0_7 = arith.constant 0 : index
    %7 = vector.load %arg7[%c0_6, %c0_7] : memref<64x32xf32, #tpu.memory_space<vmem>>, vector<64x32xf32>
    tpu.vector_store %arg7[%c0_6, %c0_7], %6 {strides = array<i32>} : memref<64x32xf32, #tpu.memory_space<vmem>>, vector<64x32xf32>,
    %c0_8 = arith.constant 0 : index
    %c0_9 = arith.constant 0 : index
    %c0_10 = arith.constant 0 : index
    %8 = vector.load %arg4[%c0_8, %c0_9, %c0_10] : memref<9x32x32xf32, #tpu.memory_space<vmem>>, vector<1x32x32xf32>
    %9 = vector.shape_cast %8 : vector<1x32x32xf32> to vector<32x32xf32>
    %c1 = arith.constant 1 : index
    %c0_11 = arith.constant 0 : index
    %c0_12 = arith.constant 0 : index
    %10 = vector.load %arg4[%c1, %c0_11, %c0_12] : memref<9x32x32xf32, #tpu.memory_space<vmem>>, vector<1x32x32xf32>
    %11 = vector.shape_cast %10 : vector<1x32x32xf32> to vector<32x32xf32>
    %c2 = arith.constant 2 : index
    %c0_13 = arith.constant 0 : index
    %c0_14 = arith.constant 0 : index
    %12 = vector.load %arg4[%c2, %c0_13, %c0_14] : memref<9x32x32xf32, #tpu.memory_space<vmem>>, vector<1x32x32xf32>
    %13 = vector.shape_cast %12 : vector<1x32x32xf32> to vector<32x32xf32>
    %c3 = arith.constant 3 : index
    %c0_15 = arith.constant 0 : index
    %c0_16 = arith.constant 0 : index
    %14 = vector.load %arg4[%c3, %c0_15, %c0_16] : memref<9x32x32xf32, #tpu.memory_space<vmem>>, vector<1x32x32xf32>
    %15 = vector.shape_cast %14 : vector<1x32x32xf32> to vector<32x32xf32>
    %c4 = arith.constant 4 : index
    %c0_17 = arith.constant 0 : index
    %c0_18 = arith.constant 0 : index
    %16 = vector.load %arg4[%c4, %c0_17, %c0_18] : memref<9x32x32xf32, #tpu.memory_space<vmem>>, vector<1x32x32xf32>
    %17 = vector.shape_cast %16 : vector<1x32x32xf32> to vector<32x32xf32>
    %c5 = arith.constant 5 : index
    %c0_19 = arith.constant 0 : index
    %c0_20 = arith.constant 0 : index
    %18 = vector.load %arg4[%c5, %c0_19, %c0_20] : memref<9x32x32xf32, #tpu.memory_space<vmem>>, vector<1x32x32xf32>
    %19 = vector.shape_cast %18 : vector<1x32x32xf32> to vector<32x32xf32>
    %c6 = arith.constant 6 : index
    %c0_21 = arith.constant 0 : index
    %c0_22 = arith.constant 0 : index
    %20 = vector.load %arg4[%c6, %c0_21, %c0_22] : memref<9x32x32xf32, #tpu.memory_space<vmem>>, vector<1x32x32xf32>
    %21 = vector.shape_cast %20 : vector<1x32x32xf32> to vector<32x32xf32>
    %c7 = arith.constant 7 : index
    %c0_23 = arith.constant 0 : index
    %c0_24 = arith.constant 0 : index
    %22 = vector.load %arg4[%c7, %c0_23, %c0_24] : memref<9x32x32xf32, #tpu.memory_space<vmem>>, vector<1x32x32xf32>
    %23 = vector.shape_cast %22 : vector<1x32x32xf32> to vector<32x32xf32>
    %c8 = arith.constant 8 : index
    %c0_25 = arith.constant 0 : index
    %c0_26 = arith.constant 0 : index
    %24 = vector.load %arg4[%c8, %c0_25, %c0_26] : memref<9x32x32xf32, #tpu.memory_space<vmem>>, vector<1x32x32xf32>
    %25 = vector.shape_cast %24 : vector<1x32x32xf32> to vector<32x32xf32>
    %c0_27 = arith.constant 0 : index
    %c0_28 = arith.constant 0 : index
    %26 = vector.load %arg5[%c0_27, %c0_28] : memref<1x32xf32, #tpu.memory_space<vmem>>, vector<1x32xf32>
    %cst_29 = arith.constant 0.000000e+00 : f32
    %27 = vector.broadcast %cst_29 : f32 to vector<1x32xf32>
    %c0_i32 = arith.constant 0 : i32
    %c6_i32 = arith.constant 6 : i32
    %28 = arith.addi %c0_i32, %c6_i32 : i32
    %c1_i32 = arith.constant 1 : i32
    %29:2 = scf.for %arg9 = %c0_i32 to %28 step %c1_i32 iter_args(%arg10 = %27, %arg11 = %27) -> (vector<1x32xf32>, vector<1x32xf32>)  : i32 {
      %cst_42 = arith.constant 0.000000e+00 : f32
      %51 = vector.broadcast %cst_42 : f32 to vector<6x32xf32>
      %c0_i32_43 = arith.constant 0 : i32
      %52 = arith.addi %arg9, %c0_i32_43 : i32
      %c8_i32 = arith.constant 8 : i32
      %53 = arith.muli %52, %c8_i32 : i32
      %54 = tpu.assume_multiple %53, 8 : i32
      %55 = arith.index_cast %54 : i32 to index
      %c0_44 = arith.constant 0 : index
      %56 = vector.load %arg7[%55, %c0_44] : memref<64x32xf32, #tpu.memory_space<vmem>>, vector<8x32xf32>
      %57 = vector.extract_strided_slice %56 {offsets = [0, 0], sizes = [6, 32], strides = [1, 1]} : vector<8x32xf32> to vector<6x32xf32>
      %cst_45 = arith.constant dense<0.000000e+00> : vector<6x32xf32>
      %58 = tpu.matmul %57, %9, %cst_45 {dimension_numbers = #tpu.dot_dimension_numbers<[1], [0], [0], [1], [0, 0, 1, 1], [], []>} : vector<6x32xf32>, vector<32x32xf32>, vector<6x32xf32> -> vector<6x32xf32>
      %59 = arith.addf %51, %58 : vector<6x32xf32>
      %60 = vector.extract_strided_slice %56 {offsets = [1, 0], sizes = [6, 32], strides = [1, 1]} : vector<8x32xf32> to vector<6x32xf32>
      %cst_46 = arith.constant dense<0.000000e+00> : vector<6x32xf32>
      %61 = tpu.matmul %60, %11, %cst_46 {dimension_numbers = #tpu.dot_dimension_numbers<[1], [0], [0], [1], [0, 0, 1, 1], [], []>} : vector<6x32xf32>, vector<32x32xf32>, vector<6x32xf32> -> vector<6x32xf32>
      %62 = arith.addf %59, %61 : vector<6x32xf32>
      %63 = vector.extract_strided_slice %56 {offsets = [2, 0], sizes = [6, 32], strides = [1, 1]} : vector<8x32xf32> to vector<6x32xf32>
      %cst_47 = arith.constant dense<0.000000e+00> : vector<6x32xf32>
      %64 = tpu.matmul %63, %13, %cst_47 {dimension_numbers = #tpu.dot_dimension_numbers<[1], [0], [0], [1], [0, 0, 1, 1], [], []>} : vector<6x32xf32>, vector<32x32xf32>, vector<6x32xf32> -> vector<6x32xf32>
      %65 = arith.addf %62, %64 : vector<6x32xf32>
      %c1_i32_48 = arith.constant 1 : i32
      %66 = arith.addi %arg9, %c1_i32_48 : i32
      %c8_i32_49 = arith.constant 8 : i32
      %67 = arith.muli %66, %c8_i32_49 : i32
      %68 = tpu.assume_multiple %67, 8 : i32
      %69 = arith.index_cast %68 : i32 to index
      %c0_50 = arith.constant 0 : index
      %70 = vector.load %arg7[%69, %c0_50] : memref<64x32xf32, #tpu.memory_space<vmem>>, vector<8x32xf32>
      %71 = vector.extract_strided_slice %70 {offsets = [0, 0], sizes = [6, 32], strides = [1, 1]} : vector<8x32xf32> to vector<6x32xf32>
      %cst_51 = arith.constant dense<0.000000e+00> : vector<6x32xf32>
      %72 = tpu.matmul %71, %15, %cst_51 {dimension_numbers = #tpu.dot_dimension_numbers<[1], [0], [0], [1], [0, 0, 1, 1], [], []>} : vector<6x32xf32>, vector<32x32xf32>, vector<6x32xf32> -> vector<6x32xf32>
      %73 = arith.addf %65, %72 : vector<6x32xf32>
      %74 = vector.extract_strided_slice %70 {offsets = [1, 0], sizes = [6, 32], strides = [1, 1]} : vector<8x32xf32> to vector<6x32xf32>
      %cst_52 = arith.constant dense<0.000000e+00> : vector<6x32xf32>
      %75 = tpu.matmul %74, %17, %cst_52 {dimension_numbers = #tpu.dot_dimension_numbers<[1], [0], [0], [1], [0, 0, 1, 1], [], []>} : vector<6x32xf32>, vector<32x32xf32>, vector<6x32xf32> -> vector<6x32xf32>
      %76 = arith.addf %73, %75 : vector<6x32xf32>
      %77 = vector.extract_strided_slice %70 {offsets = [2, 0], sizes = [6, 32], strides = [1, 1]} : vector<8x32xf32> to vector<6x32xf32>
      %cst_53 = arith.constant dense<0.000000e+00> : vector<6x32xf32>
      %78 = tpu.matmul %77, %19, %cst_53 {dimension_numbers = #tpu.dot_dimension_numbers<[1], [0], [0], [1], [0, 0, 1, 1], [], []>} : vector<6x32xf32>, vector<32x32xf32>, vector<6x32xf32> -> vector<6x32xf32>
      %79 = arith.addf %76, %78 : vector<6x32xf32>
      %c2_i32 = arith.constant 2 : i32
      %80 = arith.addi %arg9, %c2_i32 : i32
      %c8_i32_54 = arith.constant 8 : i32
      %81 = arith.muli %80, %c8_i32_54 : i32
      %82 = tpu.assume_multiple %81, 8 : i32
      %83 = arith.index_cast %82 : i32 to index
      %c0_55 = arith.constant 0 : index
      %84 = vector.load %arg7[%83, %c0_55] : memref<64x32xf32, #tpu.memory_space<vmem>>, vector<8x32xf32>
      %85 = vector.extract_strided_slice %84 {offsets = [0, 0], sizes = [6, 32], strides = [1, 1]} : vector<8x32xf32> to vector<6x32xf32>
      %cst_56 = arith.constant dense<0.000000e+00> : vector<6x32xf32>
      %86 = tpu.matmul %85, %21, %cst_56 {dimension_numbers = #tpu.dot_dimension_numbers<[1], [0], [0], [1], [0, 0, 1, 1], [], []>} : vector<6x32xf32>, vector<32x32xf32>, vector<6x32xf32> -> vector<6x32xf32>
      %87 = arith.addf %79, %86 : vector<6x32xf32>
      %88 = vector.extract_strided_slice %84 {offsets = [1, 0], sizes = [6, 32], strides = [1, 1]} : vector<8x32xf32> to vector<6x32xf32>
      %cst_57 = arith.constant dense<0.000000e+00> : vector<6x32xf32>
      %89 = tpu.matmul %88, %23, %cst_57 {dimension_numbers = #tpu.dot_dimension_numbers<[1], [0], [0], [1], [0, 0, 1, 1], [], []>} : vector<6x32xf32>, vector<32x32xf32>, vector<6x32xf32> -> vector<6x32xf32>
      %90 = arith.addf %87, %89 : vector<6x32xf32>
      %91 = vector.extract_strided_slice %84 {offsets = [2, 0], sizes = [6, 32], strides = [1, 1]} : vector<8x32xf32> to vector<6x32xf32>
      %cst_58 = arith.constant dense<0.000000e+00> : vector<6x32xf32>
      %92 = tpu.matmul %91, %25, %cst_58 {dimension_numbers = #tpu.dot_dimension_numbers<[1], [0], [0], [1], [0, 0, 1, 1], [], []>} : vector<6x32xf32>, vector<32x32xf32>, vector<6x32xf32> -> vector<6x32xf32>
      %93 = arith.addf %90, %92 : vector<6x32xf32>
      %94 = vector.broadcast %26 : vector<1x32xf32> to vector<6x32xf32>
      %95 = arith.addf %93, %94 : vector<6x32xf32>
      %96 = arith.index_cast %arg9 : i32 to index
      %c0_59 = arith.constant 0 : index
      %c0_60 = arith.constant 0 : index
      %97 = vector.load %arg8[%96, %c0_59, %c0_60] : memref<6x6x32xf32, #tpu.memory_space<vmem>>, vector<1x6x32xf32>
      %98 = vector.shape_cast %97 : vector<1x6x32xf32> to vector<6x32xf32>
      %99 = vector.shape_cast %95 : vector<6x32xf32> to vector<1x6x32xf32>
      tpu.vector_store %arg8[%96, %c0_59, %c0_60], %99 {strides = array<i32>} : memref<6x6x32xf32, #tpu.memory_space<vmem>>, vector<1x6x32xf32>,
      %cst_61 = arith.constant dense<0.000000e+00> : vector<32xf32>
      %100 = vector.multi_reduction <add>, %95, %cst_61 [0] : vector<6x32xf32> to vector<32xf32>
      %101 = vector.shape_cast %100 : vector<32xf32> to vector<1x32xf32>
      %102 = arith.addf %arg10, %101 : vector<1x32xf32>
      %103 = arith.mulf %95, %95 : vector<6x32xf32>
      %cst_62 = arith.constant dense<0.000000e+00> : vector<32xf32>
      %104 = vector.multi_reduction <add>, %103, %cst_62 [0] : vector<6x32xf32> to vector<32xf32>
      %105 = vector.shape_cast %104 : vector<32xf32> to vector<1x32xf32>
      %106 = arith.addf %arg11, %105 : vector<1x32xf32>
      scf.yield %102, %106 : vector<1x32xf32>, vector<1x32xf32>
    }
    %c6_i32_30 = arith.constant 6 : i32
    %cst_31 = arith.constant 3.600000e+01 : f32
    %30 = vector.broadcast %cst_31 : f32 to vector<1x32xf32>
    %31 = arith.divf %29#0, %30 : vector<1x32xf32>
    %cst_32 = arith.constant 3.600000e+01 : f32
    %32 = vector.broadcast %cst_32 : f32 to vector<1x32xf32>
    %33 = arith.divf %29#1, %32 : vector<1x32xf32>
    %34 = arith.mulf %31, %31 : vector<1x32xf32>
    %35 = arith.subf %33, %34 : vector<1x32xf32>
    %cst_33 = arith.constant 9.99999974E-6 : f32
    %36 = vector.broadcast %cst_33 : f32 to vector<1x32xf32>
    %37 = arith.addf %35, %36 : vector<1x32xf32>
    %38 = math.rsqrt %37 : vector<1x32xf32>
    %c0_34 = arith.constant 0 : index
    %c0_35 = arith.constant 0 : index
    %c0_36 = arith.constant 0 : index
    %39 = vector.load %arg8[%c0_34, %c0_35, %c0_36] : memref<6x6x32xf32, #tpu.memory_space<vmem>>, vector<6x6x32xf32>
    %40 = vector.shape_cast %31 : vector<1x32xf32> to vector<1x1x32xf32>
    %41 = vector.broadcast %40 : vector<1x1x32xf32> to vector<6x6x32xf32>
    %42 = arith.subf %39, %41 : vector<6x6x32xf32>
    %43 = vector.shape_cast %38 : vector<1x32xf32> to vector<1x1x32xf32>
    %44 = vector.broadcast %43 : vector<1x1x32xf32> to vector<6x6x32xf32>
    %45 = arith.mulf %42, %44 : vector<6x6x32xf32>
    %cst_37 = arith.constant 0.000000e+00 : f32
    %46 = vector.broadcast %cst_37 : f32 to vector<6x6x32xf32>
    %47 = arith.maximumf %45, %46 : vector<6x6x32xf32>
    %c0_38 = arith.constant 0 : index
    %c0_39 = arith.constant 0 : index
    %c0_40 = arith.constant 0 : index
    %c0_41 = arith.constant 0 : index
    %48 = vector.load %arg6[%c0_38, %c0_39, %c0_40, %c0_41] : memref<1x6x6x32xf32, #tpu.memory_space<vmem>>, vector<1x6x6x32xf32>
    %49 = vector.shape_cast %48 : vector<1x6x6x32xf32> to vector<6x6x32xf32>
    %50 = vector.shape_cast %47 : vector<6x6x32xf32> to vector<1x6x6x32xf32>
    tpu.vector_store %arg6[%c0_38, %c0_39, %c0_40, %c0_41], %50 {strides = array<i32>} : memref<1x6x6x32xf32, #tpu.memory_space<vmem>>, vector<1x6x6x32xf32>,
    return
  }
  func.func @transform_0(%arg0: i32) -> (i32, i32, i32) {
    %c0_i32 = arith.constant 0 : i32
    %c0_i32_0 = arith.constant 0 : i32
    %c0_i32_1 = arith.constant 0 : i32
    return %arg0, %c0_i32, %c0_i32_0 : i32, i32, i32
  }
  func.func @transform_1(%arg0: i32) -> (i32, i32) {
    %c0_i32 = arith.constant 0 : i32
    %c0_i32_0 = arith.constant 0 : i32
    %c0_i32_1 = arith.constant 0 : i32
    return %c0_i32, %c0_i32_0 : i32, i32
  }
  func.func @transform_2(%arg0: i32) -> (i32, i32) {
    %c0_i32 = arith.constant 0 : i32
    %c0_i32_0 = arith.constant 0 : i32
    %c0_i32_1 = arith.constant 0 : i32
    return %c0_i32, %c0_i32_0 : i32, i32
  }
  func.func @transform_3(%arg0: i32) -> (i32, i32, i32) {
    %c0_i32 = arith.constant 0 : i32
    %c0_i32_0 = arith.constant 0 : i32
    %c0_i32_1 = arith.constant 0 : i32
    %c0_i32_2 = arith.constant 0 : i32
    return %c0_i32, %c0_i32_0, %c0_i32_1 : i32, i32, i32
  }
  func.func @transform_4(%arg0: i32) -> (i32, i32) {
    %c0_i32 = arith.constant 0 : i32
    %c0_i32_0 = arith.constant 0 : i32
    %c0_i32_1 = arith.constant 0 : i32
    return %c0_i32, %c0_i32_0 : i32, i32
  }
  func.func @transform_5(%arg0: i32) -> (i32, i32, i32, i32) {
    %c0_i32 = arith.constant 0 : i32
    %c0_i32_0 = arith.constant 0 : i32
    %c0_i32_1 = arith.constant 0 : i32
    %c0_i32_2 = arith.constant 0 : i32
    return %arg0, %c0_i32, %c0_i32_0, %c0_i32_1 : i32, i32, i32, i32
  }
}

</mosaic_0001>

<bundles_post_ra>
// kernel: tpu_custom_call.1
= control target key start
LH: loop header
LB: loop body
LE: loop exit
PB: predicated region body
PF: predicated region fallthrough
CT: control target
= control target key end

     0   :  { %10 = vsyncpa [#allocation5], 0  ;;  %s1444_s0 = inlined_call_operand.hbm [shape: f32[2,64,64], index: 0, kind: input, shape index: {}]   ;;  %s1445_s1 = inlined_call_operand.vmem [shape: f32[64,32], index: 1, kind: input, shape index: {}]   ;;  %s1446_s2 = inlined_call_operand.vmem [shape: f32[1,32], index: 2, kind: input, shape index: {}]   ;;  %s1447_s3 = inlined_call_operand.hbm [shape: f32[9,32,32], index: 3, kind: input, shape index: {}]   ;;  %s1448_s4 = inlined_call_operand.vmem [shape: f32[1,32], index: 4, kind: input, shape index: {}]   ;;  %s1449_s5 = inlined_call_operand.vmem [shape: f32[2,6,6,32], index: 5, kind: output, shape index: {}]  }
   0x1   :  { %12 = vsyncpa [#allocation5 + $0x1], 0 }
   0x2   :  { %13 = vsyncpa [#allocation7], 0  ;;  %s1113_s18 = smov 0   ;;  %s1115_s19 = smov 0  }
   0x3   :  { %s1117_s20 = smov 0   ;;  %s1119_s21 = smov 0  }
   0x4 LB: > { %s1132_s22 = sadd.s32 4294967295, %s1065_s21   ;;  %p39_p0 = scmp.ne.s32.totalorder %s1057_s19, %s1053_s18  ;;  %s1065_s21 = sphi %s1119_s21, %s1458_s21   ;;  %s1061_s20 = sphi %s1117_s20, %s1457_s20   ;;  %s1057_s19 = sphi %s1115_s19, %s1456_s19   ;;  %s1053_s18 = sphi %s1113_s18, %s1455_s18  }
   0x5   : > { %p40_p1 = scmp.eq.s32.totalorder %s1132_s22, 0  ;;  %p813_p2 = scmp.ge.s32.totalorder %s1065_s21, 1 }
   0x6   : > { %p160_p3 = scmp.lt.s32.totalorder %s1065_s21, 3  ;;  %s177_s26 = sshll.u32 %s1447_s3, 4  ;;  %s178_s26 = int_to_ptr.hbm [resolvable:$true] %s177_s26 }
   0x7   : > { %p1140_p4 = por %p40_p1, %p39_p0  ;;  %s1079_s28 = smov [#allocation6]  }
   0x8   : > { %p1147_p5 = pnand %p813_p2, %p160_p3  ;;  %s179_s29 = sshll.u32 %s1079_s28, 4  ;;  %s180_s29 = int_to_ptr.vmem [resolvable:$true] %s179_s29 }
   0x9   : > { %s1156_s30 = sadd.s32 1, %s1065_s21   ;;  %s1080_s6 = smov 128  }
   0xa   : > { %p879_p6 = pneg %p1147_p5  ;;  %s1081_s7 = smov 8  }
   0xb   : > { %s23_s8 = ssub.s32 %s1065_s21, %s1156_s30  ;;  %s26_s9 = sadd.s32 1, %s1061_s20 }
   0xc   : > { %p880_p7 = pnand %p879_p6, %p40_p1  ;;  %p24_p8 = scmp.eq.s32.totalorder %s23_s8, 0 }
   0xd   : > { %p33_p9 = scmp.ne.s32.totalorder %s1061_s20, %s1057_s19  ;;  %p34_p10 = scmp.eq.s32.totalorder %s1065_s21, 0 }
   0xe   : > { %882 = dma.hbm_to_vmem [thread:$0]  (!%p880_p7), %s178_s26, 4608, %s180_s29, [#allocation7], %s1080_s6, %s1080_s6, %s1081_s7  }
   0xf   : > { %p888_p11 = scmp.lt.s32.totalorder %s1065_s21, 2  ;;  %p35_p12 = por %p34_p10, %p33_p9 }
  0x10   : > { %s1169_s10 = scalar_select %p24_p8, %s1061_s20, %s26_s9  }
  0x11   : > { %s196_s11 = sand.u32 1, %s1061_s20   ;;  %s847_s13 = sshll.u32 %s1065_s21, 6 }
  0x12   : > { %s816_s12 = sshll.u32 %s196_s11, 6  ;;  %s205_s16 = scalar_lea.hbm %s1444_s0, %s847_s13 }
  0x13   : > { %s200_s17 = scalar_lea.vmem [#allocation4], %s816_s12  ;;  %s206_s24 = sshll.u32 %s205_s16, 4  ;;  %s207_s24 = int_to_ptr.hbm [resolvable:$true] %s206_s24 }
  0x14   : > { %s208_s18 = sshll.u32 %s200_s17, 4  ;;  %p1176_p13 = pnand %p888_p11, %p35_p12  ;;  %s209_s18 = int_to_ptr.vmem [resolvable:$true] %s208_s18 }
  0x15   : > { %s197_s26 = scalar_lea.sflag [#allocation5], %s196_s11  ;;  %s985_s28 = sshra.s32 %s207_s24, 4  ;;  %s986_s28 = int_to_ptr.hbm [resolvable:$true] %s985_s28 }
  0x16   : > { %s987_s29 = scalar_lea.hbm %s986_s28, 64  ;;  %p989_p2 = pneg %p1176_p13 }
  0x17   : > { %p988_p0 = scmp.ne.s32.totalorder %s986_s28, %s987_s29  ;;  %s992_s9 = scalar_lea.hbm %s1444_s0, 128 }
  0x18   : > { %p993_p7 = scmp.lt.s32.totalorder %s986_s28, %s1444_s0  ;;  %p994_p8 = scmp.lt.s32.totalorder %s992_s9, %s987_s29 }
  0x19   : > { %p990_p3 = pnand %p989_p2, %p988_p0 }
  0x1a   : > { %p995_p9 = por %p994_p8, %p993_p7 }
  0x1b   : > { %p991_p6 = pneg %p990_p3 }
  0x1d   : > { %p996_p10 = pnand %p995_p9, %p991_p6 }
  0x1f   : > { %999 = shalt.err (!%p996_p10)
}
  0x20   : > { %886 = dma.hbm_to_vmem [thread:$0]  (!%p1176_p13), %s207_s24, 1024, %s209_s18, %s197_s26, %s1080_s6, %s1080_s6, %s1081_s7  }
  0x21   : > { %220 = sbr.rel (%p1147_p5) target bundleno = 425 (0x1a9), region = 40  ;;  %s222_s11 = sand.u32 (!%p1147_p5), 1, %s1057_s19  }
  0x22   : > { %s820_s14 = sshll.u32 (!%p1147_p5), %s222_s11, 6  ;;  %s223_s15 = scalar_lea.sflag (!%p1147_p5), [#allocation5], %s222_s11 }
  0x23   : > { %s1196_s16 = scalar_lea.vmem (!%p1147_p5), [#allocation4], %s820_s14 }
  0x26   : > { %1044 = dma.done.wait (%p1140_p4), %s223_s15, 1024  }
  0x27   : > { %1046 = vsyncadd (%p1140_p4), %s223_s15, 4294966272 }
  0x28   : > { %1048 = dma.done.wait (%p40_p1), [#allocation7], 4608  }
  0x29   : > { %1050 = vsyncadd (%p40_p1), [#allocation7], 4294962688  ;;  %p259_p5 = scmp.lt.s32.totalorder %s1132_s22, 1  ;;  %v1213_v0 = vld [vmem:[#allocation6] sm:$0xff]  ;;  %v1215_v1 = vld [vmem:[#allocation6 + $0x8] sm:$0xff]  ;;  %vm284_vm0 = vcmask 523264  }
  0x2a   : > { %v1217_v2 = vld [vmem:[#allocation6 + $0x10] sm:$0xff]  ;;  %v1219_v3 = vld [vmem:[#allocation6 + $0x18] sm:$0xff]  ;;  %v1221_v4 = vld [vmem:[#allocation6 + $0x20] sm:$0xff]  ;;  %vm350_vm1 = vcmask 261120  }
  0x2b   : > { %s1460_s22 = smov (!%p259_p5, %s1132_s22), 1  ;;  %v1223_v5 = vld [vmem:[#allocation6 + $0x28] sm:$0xff]  ;;  %v1225_v6 = vld [vmem:[#allocation6 + $0x30] sm:$0xff]  ;;  %v1227_v7 = vld [vmem:[#allocation6 + $0x38] sm:$0xff] }
  0x2c   : > { %s872_s27 = smul.u32 48, %s1460_s22  ;;  %v1229_v8 = vld [vmem:[#allocation6 + $0x40] sm:$0xff]  ;;  %v1231_v9 = vld [vmem:[#allocation6 + $0x48] sm:$0xff]  ;;  %v1233_v10 = vld [vmem:[#allocation6 + $0x50] sm:$0xff] }
  0x2d   : > { %v1235_v11 = vld [vmem:[#allocation6 + $0x58] sm:$0xff]  ;;  %v1237_v12 = vld [vmem:[#allocation6 + $0x60] sm:$0xff]  ;;  %v1239_v13 = vld [vmem:[#allocation6 + $0x68] sm:$0xff] }
  0x2e   : > { %s1211_s17 = scalar_lea.vmem %s1449_s5, %s872_s27  ;;  %v1241_v14 = vld [vmem:[#allocation6 + $0x70] sm:$0xff]  ;;  %v1243_v15 = vld [vmem:[#allocation6 + $0x78] sm:$0xff]  ;;  %v1245_v16 = vld [vmem:[#allocation6 + $0x80] sm:$0xff] }
  0x2f   : > { %v1247_v17 = vld [vmem:[#allocation6 + $0x88] sm:$0xff]  ;;  %v1249_v18 = vld [vmem:[#allocation6 + $0x90] sm:$0xff]  ;;  %v1251_v19 = vld [vmem:[#allocation6 + $0x98] sm:$0xff] }
  0x30   : > { %v1253_v20 = vld [vmem:[#allocation6 + $0xa0] sm:$0xff]  ;;  %v1255_v21 = vld [vmem:[#allocation6 + $0xa8] sm:$0xff]  ;;  %v1257_v22 = vld [vmem:[#allocation6 + $0xb0] sm:$0xff] }
  0x31   : > { %v1259_v23 = vld [vmem:[#allocation6 + $0xb8] sm:$0xff]  ;;  %v1261_v24 = vld [vmem:[#allocation6 + $0xc0] sm:$0xff]  ;;  %v1263_v25 = vld [vmem:[#allocation6 + $0xc8] sm:$0xff] }
  0x32   : > { %v1265_v26 = vld [vmem:[#allocation6 + $0xd0] sm:$0xff]  ;;  %v1267_v27 = vld [vmem:[#allocation6 + $0xd8] sm:$0xff]  ;;  %v1269_v28 = vld [vmem:[#allocation6 + $0xe0] sm:$0xff] }
  0x33   : > { %v1271_v29 = vld [vmem:[#allocation6 + $0xe8] sm:$0xff]  ;;  %v1273_v30 = vld [vmem:[#allocation6 + $0xf0] sm:$0xff]  ;;  %v1275_v31 = vld [vmem:[#allocation6 + $0xf8] sm:$0xff] }
  0x34   : > { %v1277_v32 = vld [vmem:[#allocation6 + $0x100] sm:$0xff]  ;;  %v1279_v33 = vld [vmem:[#allocation6 + $0x108] sm:$0xff]  ;;  %v1281_v34 = vld [vmem:[#allocation6 + $0x110] sm:$0xff] }
  0x35   : > { %v1283_v35 = vld [vmem:[#allocation6 + $0x118] sm:$0xff]  ;;  %v1288_v36 = vld [vmem:[%s1448_s4] sm:$0x1]  ;;  %v279_v37 = vld [vmem:[%s1445_s1 + $0x38] sm:$0xff] }
  0x36   : > { %v278_v38 = vld [vmem:[%s1445_s1 + $0x30] sm:$0xff]  ;;  %849 = vmatpush.msra.mxu2 %v279_v37  ;;  %850 = vmatpush.msra.mxu3 %v279_v37  ;;  %v277_v39 = vld [vmem:[%s1445_s1 + $0x28] sm:$0xff]  ;;  %v276_v40 = vld [vmem:[%s1445_s1 + $0x20] sm:$0xff] }
  0x37   : > { %317 = vmatpush.msra.mxu0 %v279_v37  ;;  %848 = vmatpush.msra.mxu1 %v279_v37  ;;  %v275_v41 = vld [vmem:[%s1445_s1 + $0x18] sm:$0xff]  ;;  %v274_v42 = vld [vmem:[%s1445_s1 + $0x10] sm:$0xff]  ;;  %v273_v43 = vld [vmem:[%s1445_s1 + $0x8] sm:$0xff] }
  0x38   : > { %852 = vmatpush.msra.mxu2 %v278_v38  ;;  %853 = vmatpush.msra.mxu3 %v278_v38  ;;  %v272_v44 = vld [vmem:[%s1445_s1] sm:$0xff]  ;;  %v268_v45 = vld [vmem:[%s1196_s16 + $0x20] sm:$0xff]  ;;  %v269_v49 = vld [vmem:[%s1196_s16 + $0x28] sm:$0xff] }
  0x39   : > { %318 = vmatpush.msra.mxu0 %v278_v38  ;;  %851 = vmatpush.msra.mxu1 %v278_v38  ;;  %v270_v46 = vld [vmem:[%s1196_s16 + $0x30] sm:$0xff]  ;;  %v264_v47 = vld [vmem:[%s1196_s16] sm:$0xff]  ;;  %v271_v50 = vld [vmem:[%s1196_s16 + $0x38] sm:$0xff] }
  0x3a   : > { %855 = vmatpush.msra.mxu2 %v277_v39  ;;  %856 = vmatpush.msra.mxu3 %v277_v39  ;;  %v266_v48 = vld [vmem:[%s1196_s16 + $0x10] sm:$0xff]  ;;  %v265_v51 = vld [vmem:[%s1196_s16 + $0x8] sm:$0xff]  ;;  %v267_v52 = vld [vmem:[%s1196_s16 + $0x18] sm:$0xff]  ;;  %s1345_s16 = smov 0  }
  0x3b   : > { %319 = vmatpush.msra.mxu0 %v277_v39  ;;  %854 = vmatpush.msra.mxu1 %v277_v39  ;;  %v950_v53 = vld [vmem:[%s1446_s2] ss:$0 sm:$0xff] }
  0x3c   : > { %858 = vmatpush.msra.mxu2 %v276_v40  ;;  %859 = vmatpush.msra.mxu3 %v276_v40 }
  0x3d   : > { %320 = vmatpush.msra.mxu0 %v276_v40  ;;  %857 = vmatpush.msra.mxu1 %v276_v40 }
  0x3e   : > { %861 = vmatpush.msra.mxu2 %v275_v41  ;;  %862 = vmatpush.msra.mxu3 %v275_v41 }
  0x3f   : > { %321 = vmatpush.msra.mxu0 %v275_v41  ;;  %860 = vmatpush.msra.mxu1 %v275_v41 }
  0x40   : > { %864 = vmatpush.msra.mxu2 %v274_v42  ;;  %865 = vmatpush.msra.mxu3 %v274_v42 }
  0x41   : > { %322 = vmatpush.msra.mxu0 %v274_v42  ;;  %863 = vmatpush.msra.mxu1 %v274_v42 }
  0x42   : > { %867 = vmatpush.msra.mxu2 %v273_v43  ;;  %868 = vmatpush.msra.mxu3 %v273_v43 }
  0x43   : > { %323 = vmatpush.msra.mxu0 %v273_v43  ;;  %866 = vmatpush.msra.mxu1 %v273_v43  ;;  %v1341_v43 = vmov 0.0  }
  0x44   : > { %870 = vmatpush.msra.mxu2 %v272_v44  ;;  %871 = vmatpush.msra.mxu3 %v272_v44 }
  0x45   : > { %827 = vmatmul.msk.f32.vlgmr.msra.gmra.mxu2 %vm284_vm0, %v268_v45  ;;  %829 = vmatmul.msk.f32.vlgmr.msra.gmra.mxu3 %vm284_vm0, %v270_v46 }
  0x46   : > { %324 = vmatpush.msra.mxu0 %v272_v44  ;;  %869 = vmatpush.msra.mxu1 %v272_v44  ;;  %v1343_v44 = vmov 0.0  }
  0x47   : > { %823 = vmatmul.msk.f32.vlgmr.msra.gmra.mxu0 %vm284_vm0, %v264_v47  ;;  %825 = vmatmul.msk.f32.vlgmr.msra.gmra.mxu1 %vm284_vm0, %v266_v48 }
  0x4d   : > { %828 = vmatmul.msk.f32.gmra.mxu2 %vm284_vm0, %v269_v49  ;;  %830 = vmatmul.msk.f32.gmra.mxu3 %vm284_vm0, %v271_v50 }
  0x4f   : > { %824 = vmatmul.msk.f32.gmra.mxu0 %vm284_vm0, %v265_v51  ;;  %826 = vmatmul.msk.f32.gmra.mxu1 %vm284_vm0, %v267_v52 }
  0xc4   : > { %v326_v54 = vpop.f32.mrf.mxu0  ;;  %v332_v55 = vpop.f32.mrf.mxu1 }
  0xc5   : > { %v327_v56 = vadd.f32 %v950_v53, %v326_v54  ;;  %v333_v57 = vadd.f32 %v950_v53, %v332_v55 }
  0xc7   : > { %351 = vst.msk [vmem:[#allocation2] sm:$0xff] %vm350_vm1, %v327_v56 }
  0xc8   : > { %353 = vst.msk [vmem:[#allocation2 + $0x10] sm:$0xff] %vm350_vm1, %v333_v57  ;;  %v338_v58 = vpop.f32.mrf.mxu2  ;;  %v344_v59 = vpop.f32.mrf.mxu3 }
  0xc9   : > { %v339_v60 = vadd.f32 %v950_v53, %v338_v58  ;;  %v345_v61 = vadd.f32 %v950_v53, %v344_v59 }
  0xcb   : > { %355 = vst.msk [vmem:[#allocation2 + $0x20] sm:$0xff] %vm350_vm1, %v339_v60 }
  0xcc   : > { %357 = vst.msk [vmem:[#allocation2 + $0x30] sm:$0xff] %vm350_vm1, %v345_v61  ;;  %v329_v62 = vpop.f32.mrf.mxu0  ;;  %v335_v63 = vpop.f32.mrf.mxu1 }
  0xcd   : > { %v330_v37 = vadd.f32 %v950_v53, %v329_v62  ;;  %v336_v38 = vadd.f32 %v950_v53, %v335_v63 }
  0xcf   : > { %352 = vst.msk [vmem:[#allocation2 + $0x8] sm:$0xff] %vm350_vm1, %v330_v37 }
  0xd0   : > { %354 = vst.msk [vmem:[#allocation2 + $0x18] sm:$0xff] %vm350_vm1, %v336_v38  ;;  %v341_v39 = vpop.f32.mrf.mxu2  ;;  %v347_v40 = vpop.f32.mrf.mxu3 }
  0xd1   : > { %v342_v41 = vadd.f32 %v950_v53, %v341_v39  ;;  %v348_v42 = vadd.f32 %v950_v53, %v347_v40 }
  0xd3   : > { %356 = vst.msk [vmem:[#allocation2 + $0x28] sm:$0xff] %vm350_vm1, %v342_v41 }
  0xd4   : > { %358 = vst.msk [vmem:[#allocation2 + $0x38] sm:$0xff] %vm350_vm1, %v348_v42 }
  0xd5 LB: >> { %476 = vmatpush.msra.mxu2 %v1235_v11  ;;  %431 = vmatpush.msra.mxu0 %v1227_v7  ;;  %s831_s23 = sshll.u32 %s1077_s16, 3  ;;  %vm642_vm2 = vcmask 259072   ;;  %s409_s16 = sadd.s32 1, %s1077_s16   ;;  %s1077_s16 = sphi %s1345_s16, %s409_s16   ;;  %v1073_v44 = vphi %v1343_v44, %v1454_v44   ;;  %v1069_v43 = vphi %v1341_v43, %v1453_v43  }
  0xd6   : >> { %453 = vmatpush.msra.mxu1 %v1219_v3  ;;  %504 = vmatpush.msra.mxu3 %v1243_v15  ;;  %s413_s18 = scalar_lea.vmem [#allocation2], %s831_s23  ;;  %s641_s24 = scalar_lea.vmem [#allocation3], %s831_s23 }
  0xd7   : >> { %477 = vmatpush.msra.mxu2 %v1233_v10  ;;  %432 = vmatpush.msra.mxu0 %v1225_v6  ;;  %p406_p1 = scmp.ge.s32.totalorder %s409_s16, 6  }
  0xd8   : >> { %454 = vmatpush.msra.mxu1 %v1217_v2  ;;  %505 = vmatpush.msra.mxu3 %v1241_v14 }
  0xd9   : >> { %478 = vmatpush.msra.mxu2 %v1231_v9  ;;  %433 = vmatpush.msra.mxu0 %v1223_v5 }
  0xda   : >> { %455 = vmatpush.msra.mxu1 %v1215_v1  ;;  %506 = vmatpush.msra.mxu3 %v1239_v13 }
  0xdb   : >> { %v414_v45 = vld [vmem:[%s413_s18] sm:$0xff]  ;;  %479 = vmatpush.msra.mxu2 %v1229_v8  ;;  %434 = vmatpush.msra.mxu0 %v1221_v4  ;;  %v836_v48 = vld [vmem:[%s413_s18 + $0x8] sm:$0xff]  ;;  %v841_v49 = vld [vmem:[%s413_s18 + $0x10] sm:$0xff] }
  0xdc   : >> { %v461_v46 = vrot.slane %v414_v45, 2  ;;  %v416_v47 = vrot.slane %v414_v45, 1  ;;  %456 = vmatpush.msra.mxu1 %v1213_v0  ;;  %507 = vmatpush.msra.mxu3 %v1237_v12  ;;  %v513_v50 = vrot.slane %v836_v48, 1  ;;  %v589_v51 = vrot.slane %v841_v49, 1 }
  0xdd   : >> { %580 = vmatpush.msrb.mxu2 %v1267_v27  ;;  %833 = vmatmul.msk.f32.vlgmr.msra.gmra.mxu1 %vm350_vm1, %v414_v45  ;;  %v537_v52 = vrot.slane %v836_v48, 2  ;;  %v613_v53 = vrot.slane %v841_v49, 2  ;;  %v638_v45 = vperm.slane %v1288_v36, 0 }
  0xde   : >> { %834 = vmatmul.msk.f32.vlgmr.msra.gmra.mxu2 %vm350_vm1, %v461_v46  ;;  %832 = vmatmul.msk.f32.vlgmr.msra.gmra.mxu0 %vm350_vm1, %v416_v47 }
  0xdf   : >> { %837 = vmatmul.msk.f32.vlgmr.msra.gmra.mxu3 %vm350_vm1, %v836_v48  ;;  %528 = vmatpush.msrb.mxu0 %v1251_v19 }
  0xe0   : >> { %581 = vmatpush.msrb.mxu2 %v1265_v26  ;;  %604 = vmatpush.msrb.mxu3 %v1275_v31 }
  0xe1   : >> { %529 = vmatpush.msrb.mxu0 %v1249_v18  ;;  %552 = vmatpush.msrb.mxu1 %v1259_v23 }
  0xe2   : >> { %582 = vmatpush.msrb.mxu2 %v1263_v25  ;;  %605 = vmatpush.msrb.mxu3 %v1273_v30 }
  0xe3   : >> { %530 = vmatpush.msrb.mxu0 %v1247_v17  ;;  %553 = vmatpush.msrb.mxu1 %v1257_v22 }
  0xe4   : >> { %583 = vmatpush.msrb.mxu2 %v1261_v24  ;;  %606 = vmatpush.msrb.mxu3 %v1271_v29 }
  0xe5   : >> { %531 = vmatpush.msrb.mxu0 %v1245_v16  ;;  %554 = vmatpush.msrb.mxu1 %v1255_v21 }
  0xe6   : >> { %842 = vmatmul.msk.f32.vlgmr.msrb.gmra.mxu2 %vm350_vm1, %v841_v49  ;;  %607 = vmatpush.msrb.mxu3 %v1269_v28 }
  0xe7   : >> { %838 = vmatmul.msk.f32.vlgmr.msrb.gmra.mxu0 %vm350_vm1, %v513_v50  ;;  %555 = vmatpush.msrb.mxu1 %v1253_v20 }
  0xe8   : >> { %843 = vmatmul.msk.f32.vlgmr.msrb.gmra.mxu3 %vm350_vm1, %v589_v51  ;;  %628 = vmatpush.msra.mxu0 %v1283_v35 }
  0xe9   : >> { %839 = vmatmul.msk.f32.vlgmr.msrb.gmra.mxu1 %vm350_vm1, %v537_v52 }
  0xea   : >> { %629 = vmatpush.msra.mxu0 %v1281_v34 }
  0xec   : >> { %630 = vmatpush.msra.mxu0 %v1279_v33 }
  0xee   : >> { %631 = vmatpush.msra.mxu0 %v1277_v32 }
  0xef   : >> { %844 = vmatmul.msk.f32.vlgmr.msra.gmra.mxu0 %vm350_vm1, %v613_v53 }
 0x15a   : >> { %v458_v55 = vpop.f32.mrf.mxu1 }
 0x15b   : >> { %v436_v54 = vpop.f32.mrf.mxu0 }
 0x15c   : >> { %v459_v56 = vadd.f32 %v458_v55, %v436_v54 }
 0x161   : >> { %v481_v57 = vpop.f32.mrf.mxu2 }
 0x162   : >> { %v484_v58 = vadd.f32 %v481_v57, %v459_v56  ;;  %v509_v59 = vpop.f32.mrf.mxu3 }
 0x164   : >> { %v512_v60 = vadd.f32 %v509_v59, %v484_v58  ;;  %v533_v61 = vpop.f32.mrf.mxu0 }
 0x166   : >> { %v536_v62 = vadd.f32 %v533_v61, %v512_v60  ;;  %v557_v63 = vpop.f32.mrf.mxu1 }
 0x168   : >> { %v560_v37 = vadd.f32 %v557_v63, %v536_v62 }
 0x169   : >> { %v585_v38 = vpop.f32.mrf.mxu2 }
 0x16a   : >> { %v588_v39 = vadd.f32 %v585_v38, %v560_v37  ;;  %v1082_v38 = vmov (%p406_p1), 36.0  }
 0x16b   : >> { %v609_v40 = vpop.f32.mrf.mxu3  ;;  %951 = vrcp.f32 (%p406_p1), %v1082_v38 }
 0x16c   : >> { %v612_v41 = vadd.f32 %v609_v40, %v588_v39  ;;  %v633_v42 = vpop.f32.mrf.mxu0 }
 0x16e   : >> { %v636_v46 = vadd.f32 %v633_v42, %v612_v41 }
 0x170   : >> { %v640_v47 = vadd.f32 %v638_v45, %v636_v46 }
 0x171   : > { %v952_v39 = vpop.eup (%p406_p1), %951 }
 0x172   : >> { %643 = vst.msk [vmem:[%s641_s24] sm:$0x3f] %vm642_vm2, %v640_v47  ;;  %v644_v48 = vsel %vm642_vm2, %v640_v47, 0.0  ;;  %v652_v49 = vmul.f32 %v640_v47, %v640_v47  ;;  %v662_v40 = vmul.f32 (%p406_p1), 36.0, %v952_v39  ;;  %vm666_vm3 = vweird.f32 (%p406_p1), %v952_v39 }
 0x173   : >> { %v645_v50 = vrot.slane %v644_v48, 4 }
 0x174   : >> { %v653_v51 = vsel %vm642_vm2, %v652_v49, 0.0  ;;  %v663_v41 = vsub.f32 (%p406_p1), 1.0, %v662_v40 }
 0x175   : >> { %v646_v52 = vadd.f32 %v645_v50, %v644_v48  ;;  %v654_v53 = vrot.slane %v653_v51, 4 }
 0x176   : > { %v664_v42 = vmul.f32 (%p406_p1), %v952_v39, %v663_v41 }
 0x177   : >> { %v647_v54 = vrot.slane %v646_v52, 2  ;;  %v655_v55 = vadd.f32 %v654_v53, %v653_v51 }
 0x179   : >> { %v648_v56 = vadd.f32 %v647_v54, %v646_v52  ;;  %v656_v57 = vrot.slane %v655_v55, 2  ;;  %v683_v54 = vld [vmem:[#allocation3] sm:$0x3f] (%p406_p1)  ;;  %v685_v1 = vld [vmem:[#allocation3 + $0x10] sm:$0x3f] (%p406_p1) }
 0x17a   : > { %v686_v2 = vld [vmem:[#allocation3 + $0x18] sm:$0x3f] (%p406_p1)  ;;  %v687_v3 = vld [vmem:[#allocation3 + $0x20] sm:$0x3f] (%p406_p1)  ;;  %v688_v4 = vld [vmem:[#allocation3 + $0x28] sm:$0x3f] (%p406_p1) }
 0x17b   : >> { %v649_v58 = vrot.slane %v648_v56, 1  ;;  %v657_v59 = vadd.f32 %v656_v57, %v655_v55  ;;  %v684_v55 = vld [vmem:[#allocation3 + $0x8] sm:$0x3f] (%p406_p1) }
 0x17d   : >> { %v650_v60 = vadd.f32 %v649_v58, %v648_v56  ;;  %v658_v61 = vrot.slane %v657_v59, 1 }
 0x17f   : >> { %v651_v62 = vadd.f32 %v1073_v44, %v650_v60   ;;  %v659_v63 = vadd.f32 %v658_v61, %v657_v59  ;;  %408 = sbr.rel (!%p406_p1) target bundleno = 213 (0xd5), region = 103 }
 0x181   : >> { %v660_v37 = vadd.f32 %v1069_v43, %v659_v63   ;;  %v1454_v44 = vmov %v651_v62 }
 0x182   : > { %v665_v44 = vadd.f32 (%p406_p1), %v952_v39, %v664_v42 }
 0x183   : >> { %v1453_v43 = vmov %v660_v37 }
 0x184   : > { %v667_v45 = vsel %vm666_vm3, %v952_v39, %v665_v44 }
 0x185   : > { %v668_v46 = vmul.f32 %v667_v45, %v651_v62  ;;  %v669_v47 = vmul.f32 %v667_v45, %v660_v37 }
 0x187   : > { %v670_v48 = vmul.f32 %v668_v46, %v668_v46  ;;  %v689_v6 = vsub.f32 %v683_v54, %v668_v46  ;;  %v690_v7 = vsub.f32 %v684_v55, %v668_v46  ;;  %v691_v8 = vsub.f32 %v685_v1, %v668_v46 }
 0x188   : > { %v692_v9 = vsub.f32 %v686_v2, %v668_v46  ;;  %v693_v11 = vsub.f32 %v687_v3, %v668_v46  ;;  %v694_v12 = vsub.f32 %v688_v4, %v668_v46 }
 0x189   : > { %v671_v49 = vsub.f32 %v669_v47, %v670_v48 }
 0x18b   : > { %v672_v50 = vadd.f32 1e-05, %v671_v49 }
 0x18d   : > { %953 = vrsqrt.f32 %v672_v50  ;;  %vm679_vm4 = vweird.f32 %v672_v50 }
 0x193   : > { %v954_v51 = vpop.eup %953 }
 0x194   : > { %v674_v52 = vmul.f32 %v954_v51, %v672_v50  ;;  %vm680_vm5 = vweird.f32 %v954_v51 }
 0x195   : > { %vm681_vm6 = vmor %vm679_vm4, %vm680_vm5 }
 0x196   : > { %v675_v53 = vmul.f32 %v954_v51, %v674_v52 }
 0x198   : > { %v676_v0 = vmul.f32 0.5, %v675_v53 }
 0x19a   : > { %v677_v5 = vsub.f32 1.5, %v676_v0 }
 0x19c   : > { %v678_v10 = vmul.f32 %v954_v51, %v677_v5 }
 0x19e   : > { %v682_v13 = vsel %vm681_vm6, %v954_v51, %v678_v10 }
 0x19f   : > { %v695_v14 = vmul.f32 %v689_v6, %v682_v13  ;;  %v696_v15 = vmul.f32 %v690_v7, %v682_v13  ;;  %v697_v16 = vmul.f32 %v691_v8, %v682_v13  ;;  %v698_v17 = vmul.f32 %v692_v9, %v682_v13 }
 0x1a0   : > { %v699_v18 = vmul.f32 %v693_v11, %v682_v13  ;;  %v700_v19 = vmul.f32 %v694_v12, %v682_v13 }
 0x1a1   : > { %v701_v20 = vmax.f32 %v695_v14, 0.0  ;;  %v702_v21 = vmax.f32 %v696_v15, 0.0  ;;  %v703_v22 = vmax.f32 %v697_v16, 0.0  ;;  %v704_v23 = vmax.f32 %v698_v17, 0.0 }
 0x1a2   : > { %v705_v24 = vmax.f32 %v699_v18, 0.0  ;;  %v706_v25 = vmax.f32 %v700_v19, 0.0 }
 0x1a3   : > { %708 = vst.msk [vmem:[%s1211_s17] sm:$0x3f] %vm642_vm2, %v701_v20 }
 0x1a4   : > { %709 = vst.msk [vmem:[%s1211_s17 + $0x8] sm:$0x3f] %vm642_vm2, %v702_v21 }
 0x1a5   : > { %710 = vst.msk [vmem:[%s1211_s17 + $0x10] sm:$0x3f] %vm642_vm2, %v703_v22 }
 0x1a6   : > { %711 = vst.msk [vmem:[%s1211_s17 + $0x18] sm:$0x3f] %vm642_vm2, %v704_v23 }
 0x1a7   : > { %712 = vst.msk [vmem:[%s1211_s17 + $0x20] sm:$0x3f] %vm642_vm2, %v705_v24 }
 0x1a8   : > { %713 = vst.msk [vmem:[%s1211_s17 + $0x28] sm:$0x3f] %vm642_vm2, %v706_v25 }
 0x1a9 PF: > { %p16_p4 = scmp.ge.s32.totalorder %s1156_s30, 4   ;;  %s1455_s18 = smov %s1057_s19 }
 0x1aa   : > { %s1456_s19 = smov %s1061_s20  ;;  %s1457_s20 = smov %s1169_s10 }
 0x1ab   : > { %s1458_s21 = smov %s1156_s30  ;;  %18 = sbr.rel (!%p16_p4) target bundleno = 4 (0x4), region = 114 }
 0x1b0   :  { %735 = vsyncpa [#allocation5], 1 }
 0x1b1   :  { %737 = vsyncpa [#allocation5 + $0x1], 1 }
 0x1b2   :  { %738 = vsyncpa [#allocation7], 1 }

</bundles_post_ra>
